<compile_context>
chip_gen: v7x
topology: tpu7x:2x2x1
jax: 0.10.0
libtpu: 0.0.40
codegen_flags: <defaults>
</compile_context>

<pallas_src>
import functools

import jax
import jax.numpy as jnp
from jax.experimental import pallas as pl
from jax.experimental.pallas import tpu as pltpu

SMOOTH = 1.0
EPS = 1e-7

_LANE = 128
_MAX_TILE_S = 512              # >=512-row tiles reach ~85% of HBM roofline
_LOGITS_VMEM_BUDGET = 8 << 20  # bytes for the double-buffered logits stream


def _round_up(x, m):
    return (x + m - 1) // m * m


def _dice_partial_kernel(logits_ref, target_ref, out_ref, *, use_mask):
    """Accumulate per-class (intersection, sum(probs), sum(one-hot)) partials.

    logits_ref: (1, C, TS, 128) native dtype
    target_ref: (1, TS, 128)    int8/int32 class ids, -1 marks padded pixels
    out_ref:    (1, 1, 3, C, 128) f32, resident across the pixel ("arbitrary") axis
    """
    p = pl.program_id(2)

    @pl.when(p == 0)
    def _():
        out_ref[...] = jnp.zeros_like(out_ref)

    # Cast after load: HBM stream stays in the input's native dtype.
    logits = logits_ref[0].astype(jnp.float32)                  # (C, TS, 128)
    tgt = target_ref[0].astype(jnp.int32)                       # (TS, 128)

    # Per-pixel softmax over the class axis (axis 0 = cheap cross-vreg VPU ops).
    mx = jnp.max(logits, axis=0, keepdims=True)
    ex = jnp.exp(logits - mx)
    inv = pl.reciprocal(jnp.sum(ex, axis=0, keepdims=True), approx=True)  # EUP
    probs = ex * inv                                            # (C, TS, 128)

    cls_ids = jax.lax.broadcasted_iota(jnp.int32, probs.shape, 0)
    match = cls_ids == tgt[None]                                # one-hot mask

    # Padded / out-of-bounds pixels carry target == -1, so `match` is False and
    # they never reach intersection or the one-hot cardinality.  Selecting with
    # where() (rather than multiplying) also blocks NaN/Inf garbage that may
    # live in the unread tail of a ragged edge block.
    inter = jnp.sum(jnp.where(match, probs, 0.0), axis=1)       # (C, 128)
    if use_mask:
        valid = (tgt >= 0)[None]                                # (1, TS, 128)
        psum = jnp.sum(jnp.where(valid, probs, 0.0), axis=1)    # (C, 128)
    else:
        psum = jnp.sum(probs, axis=1)                           # (C, 128)
    tsum = jnp.sum(match.astype(jnp.float32), axis=1)           # (C, 128)

    out_ref[0, 0, 0] += inter
    out_ref[0, 0, 1] += psum
    out_ref[0, 0, 2] += tsum


def dice_loss(output, target, log_cosh=False):
    """output: (N, C, H, W) float logits, target: (N, H, W) integer class ids."""
    n, c, h, w = output.shape
    m = h * w
    s = -(-m // _LANE)                       # sublane rows holding the pixel axis
    itemsize = jnp.dtype(output.dtype).itemsize
    tgt_dtype = jnp.int8 if c <= 127 else jnp.int32
    tgt_itemsize = jnp.dtype(tgt_dtype).itemsize

    # Engage both TensorCores (v7x megacore) for batch-1 inputs by splitting
    # the pixel axis into two independently-accumulated halves.
    n_split = 2 if (n == 1 and s >= 64) else 1

    # Pixel tile: as large as the VMEM budget for the double-buffered logits
    # block allows (multiple of 32 rows so int8 targets stay tile-aligned).
    tile_cand = _LOGITS_VMEM_BUDGET // (2 * c * _LANE * itemsize)
    tile_cand = max(32, min((tile_cand // 32) * 32, _MAX_TILE_S))
    tiles_per_split = max(1, -(-s // (n_split * tile_cand)))
    n_tiles = n_split * tiles_per_split
    if n_tiles == 1:
        tile_s = s                           # single full-extent block, always legal
    else:
        tile_s = _round_up(-(-s // n_tiles), 32)
    rows_total = n_tiles * tile_s            # rows touched by the grid (>= s)

    # Logits: native dtype, padded only to 128-lane granularity (no pad at all
    # when H*W is already a multiple of 128), reshaped to (N, C, S, 128).
    logits = output.reshape(n, c, m)
    lane_pad = s * _LANE - m
    if lane_pad:
        logits = jnp.pad(logits, ((0, 0), (0, 0), (0, lane_pad)))
    logits = logits.reshape(n, c, s, _LANE)

    # Targets: tiny 1-byte/pixel stream, padded with -1 over every position the
    # grid touches beyond the real pixels (lane padding + ragged row tiles).
    tgt = target.reshape(n, m).astype(tgt_dtype)
    tgt_pad = rows_total * _LANE - m
    if tgt_pad:
        tgt = jnp.pad(tgt, ((0, 0), (0, tgt_pad)), constant_values=-1)
    tgt = tgt.reshape(n, rows_total, _LANE)

    needs_mask = (lane_pad != 0) or (rows_total != s)
    last_blk = -(-s // tile_s) - 1           # last in-bounds logits row-block

    def logits_map(b, hs, p):
        # Clamp so a phantom trailing tile never maps outside the logits array;
        # its target block is all -1 so it contributes nothing.
        return (b, 0, jnp.minimum(hs * tiles_per_split + p, last_blk), 0)

    def target_map(b, hs, p):
        return (b, hs * tiles_per_split + p, 0)

    def out_map(b, hs, p):
        return (b, hs, 0, 0, 0)

    cost = pl.CostEstimate(
        flops=10 * n * c * rows_total * _LANE,
        transcendentals=n * c * rows_total * _LANE,
        bytes_accessed=(logits.size * itemsize
                        + tgt.size * tgt_itemsize
                        + n * n_split * 3 * c * _LANE * 4),
    )

    vmem_need = (2 * (c * tile_s * _LANE * itemsize + tile_s * _LANE * tgt_itemsize)
                 + 3 * c * _LANE * 4)
    params = dict(dimension_semantics=("parallel", "parallel", "arbitrary"))
    if vmem_need > (24 << 20):               # only raise the limit when needed
        params["vmem_limit_bytes"] = min(vmem_need + (8 << 20), 100 << 20)

    parts = pl.pallas_call(
        functools.partial(_dice_partial_kernel, use_mask=needs_mask),
        out_shape=jax.ShapeDtypeStruct((n, n_split, 3, c, _LANE), jnp.float32),
        grid_spec=pltpu.PrefetchScalarGridSpec(
            num_scalar_prefetch=0,
            grid=(n, n_split, tiles_per_split),
            in_specs=[
                pl.BlockSpec((1, c, tile_s, _LANE), logits_map),
                pl.BlockSpec((1, tile_s, _LANE), target_map),
            ],
            out_specs=pl.BlockSpec((1, 1, 3, c, _LANE), out_map),
        ),
        compiler_params=pltpu.CompilerParams(**params),
        cost_estimate=cost,
    )(logits, tgt)

    # Tiny epilogue in plain JAX: reduce lanes/batch/splits, dice, mean, log-cosh.
    sums = jnp.sum(parts, axis=(0, 1, 4))    # (3, C)
    inter, psum, tsum = sums[0], sums[1], sums[2]
    dice = (2.0 * inter + SMOOTH) / jnp.maximum(psum + tsum + SMOOTH, EPS)
    loss = jnp.sum((1.0 - dice) * (tsum > 0.0).astype(jnp.float32)) / c
    if log_cosh:
        loss = jnp.log((jnp.exp(loss) + jnp.exp(-loss)) / 2.0)
    return loss


def dice_loss_ref(output, target, log_cosh=False):
    """Plain-JAX reference matching smp.losses.DiceLoss(mode='multiclass')."""
    n, c = output.shape[0], output.shape[1]
    p = jax.nn.softmax(output.astype(jnp.float32), axis=1).reshape(n, c, -1)
    t = jax.nn.one_hot(target.reshape(n, -1), c, dtype=jnp.float32).transpose(0, 2, 1)
    dims = (0, 2)
    inter = jnp.sum(p * t, axis=dims)
    card = jnp.sum(p + t, axis=dims)
    dice = (2.0 * inter + SMOOTH) / jnp.maximum(card + SMOOTH, EPS)
    loss = (1.0 - dice) * (jnp.sum(t, axis=dims) > 0).astype(jnp.float32)
    loss = jnp.mean(loss)
    if log_cosh:
        loss = jnp.log((jnp.exp(loss) + jnp.exp(-loss)) / 2.0)
    return loss


if __name__ == "__main__":
    key = jax.random.PRNGKey(0)
    k1, k2, k3, k4, k5, k6 = jax.random.split(key, 6)

    # Tolerance: pl.reciprocal(approx=True) in the softmax introduces ~1e-4-level
    # drift vs. the exact reference (per perf review) -- acceptable for a loss.
    TOL = 1e-3

    # Primary shapes consistent with the PyTorch module: NCHW logits, class-id targets.
    out1 = jax.random.normal(k1, (2, 4, 16, 16), dtype=jnp.float32)
    tgt1 = jax.random.randint(k2, (2, 16, 16), 0, 4, dtype=jnp.int32)
    for lc in (False, True):
        got = dice_loss(out1, tgt1, log_cosh=lc)
        jax.block_until_ready(got)
        want = dice_loss_ref(out1, tgt1, log_cosh=lc)
        assert abs(float(got) - float(want)) < TOL, (lc, float(got), float(want))

    # Ragged H*W (not a multiple of 128): exercises the lane-pad / -1 mask path.
    out2 = jax.random.normal(k3, (2, 4, 10, 10), dtype=jnp.float32)
    tgt2 = jax.random.randint(k4, (2, 10, 10), 0, 4, dtype=jnp.int32)
    got2 = dice_loss(out2, tgt2)
    jax.block_until_ready(got2)
    want2 = dice_loss_ref(out2, tgt2)
    assert abs(float(got2) - float(want2)) < TOL, (float(got2), float(want2))

    # Batch-1 input: exercises the two-way pixel split (megacore path on v7x).
    out3 = jax.random.normal(k5, (1, 3, 96, 96), dtype=jnp.float32)
    tgt3 = jax.random.randint(k6, (1, 96, 96), 0, 3, dtype=jnp.int32)
    got3 = dice_loss(out3, tgt3)
    jax.block_until_ready(got3)
    want3 = dice_loss_ref(out3, tgt3)
    assert abs(float(got3) - float(want3)) < TOL, (float(got3), float(want3))

    print("KERNEL_OK")
</pallas_src>

<mosaic_0001>
module attributes {stable_mosaic.version = 11 : i64} {
  func.func @_dice_partial_kernel(%arg0: i32, %arg1: i32, %arg2: i32, %arg3: memref<1x4x2x128xf32, #tpu.memory_space<vmem>>, %arg4: memref<1x2x128xi8, #tpu.memory_space<vmem>>, %arg5: memref<1x1x3x4x128xf32, #tpu.memory_space<vmem>>) attributes {dimension_semantics = [#tpu.dimension_semantics<parallel>, #tpu.dimension_semantics<parallel>, #tpu.dimension_semantics<arbitrary>], iteration_bounds = array<i64: 2, 1, 1>, scalar_prefetch = 0 : i64, scratch_operands = 0 : i64, tpu.core_type = #tpu.core_type<tc>, window_params = [{transform_indices = @transform_0, window_bounds = array<i64: 1, 4, 2, 128>}, {transform_indices = @transform_1, window_bounds = array<i64: 1, 2, 128>}, {transform_indices = @transform_2, window_bounds = array<i64: 1, 1, 3, 4, 128>}]} {
    %c0_i32 = arith.constant 0 : i32
    %0 = arith.cmpi eq, %arg2, %c0_i32 : i32
    %1 = arith.extui %0 : i1 to i32
    %c0_i32_0 = arith.constant 0 : i32
    %2 = arith.cmpi ne, %1, %c0_i32_0 : i32
    scf.if %2 {
      %cst_40 = arith.constant 0.000000e+00 : f32
      %47 = vector.broadcast %cst_40 : f32 to vector<1x1x3x4x128xf32>
      %c0_41 = arith.constant 0 : index
      %c0_42 = arith.constant 0 : index
      %c0_43 = arith.constant 0 : index
      %c0_44 = arith.constant 0 : index
      %c0_45 = arith.constant 0 : index
      %48 = vector.load %arg5[%c0_41, %c0_42, %c0_43, %c0_44, %c0_45] : memref<1x1x3x4x128xf32, #tpu.memory_space<vmem>>, vector<1x1x3x4x128xf32>
      tpu.vector_store %arg5[%c0_41, %c0_42, %c0_43, %c0_44, %c0_45], %47 {strides = array<i32>} : memref<1x1x3x4x128xf32, #tpu.memory_space<vmem>>, vector<1x1x3x4x128xf32>,
    } else {
    }
    %c0 = arith.constant 0 : index
    %c0_1 = arith.constant 0 : index
    %c0_2 = arith.constant 0 : index
    %c0_3 = arith.constant 0 : index
    %3 = vector.load %arg3[%c0, %c0_1, %c0_2, %c0_3] : memref<1x4x2x128xf32, #tpu.memory_space<vmem>>, vector<1x4x2x128xf32>
    %4 = vector.shape_cast %3 : vector<1x4x2x128xf32> to vector<4x2x128xf32>
    %c0_4 = arith.constant 0 : index
    %c0_5 = arith.constant 0 : index
    %c0_6 = arith.constant 0 : index
    %5 = vector.load %arg4[%c0_4, %c0_5, %c0_6] : memref<1x2x128xi8, #tpu.memory_space<vmem>>, vector<1x2x128xi8>
    %6 = vector.shape_cast %5 : vector<1x2x128xi8> to vector<2x128xi8>
    %7 = arith.extsi %6 : vector<2x128xi8> to vector<2x128xi32>
    %cst = arith.constant dense<0xFF800000> : vector<2x128xf32>
    %8 = vector.multi_reduction <maximumf>, %4, %cst [0] : vector<4x2x128xf32> to vector<2x128xf32>
    %9 = vector.shape_cast %8 : vector<2x128xf32> to vector<1x2x128xf32>
    %10 = vector.broadcast %9 : vector<1x2x128xf32> to vector<4x2x128xf32>
    %11 = arith.subf %4, %10 : vector<4x2x128xf32>
    %12 = math.exp %11 : vector<4x2x128xf32>
    %cst_7 = arith.constant dense<0.000000e+00> : vector<2x128xf32>
    %13 = vector.multi_reduction <add>, %12, %cst_7 [0] : vector<4x2x128xf32> to vector<2x128xf32>
    %14 = vector.shape_cast %13 : vector<2x128xf32> to vector<1x2x128xf32>
    %15 = tpu.reciprocal %14 {approx = true} : vector<1x2x128xf32> -> vector<1x2x128xf32>
    %16 = vector.broadcast %15 : vector<1x2x128xf32> to vector<4x2x128xf32>
    %17 = arith.mulf %12, %16 : vector<4x2x128xf32>
    %18 = tpu.iota {dimensions = array<i32: 0>} : vector<4x2x128xi32>
    %19 = vector.shape_cast %7 : vector<2x128xi32> to vector<1x2x128xi32>
    %20 = vector.broadcast %19 : vector<1x2x128xi32> to vector<4x2x128xi32>
    %21 = arith.cmpi eq, %18, %20 : vector<4x2x128xi32>
    %cst_8 = arith.constant 0.000000e+00 : f32
    %22 = vector.broadcast %cst_8 : f32 to vector<4x2x128xf32>
    %23 = arith.select %21, %17, %22 : vector<4x2x128xi1>, vector<4x2x128xf32>
    %cst_9 = arith.constant dense<0.000000e+00> : vector<4x128xf32>
    %24 = vector.multi_reduction <add>, %23, %cst_9 [1] : vector<4x2x128xf32> to vector<4x128xf32>
    %cst_10 = arith.constant dense<0.000000e+00> : vector<4x128xf32>
    %25 = vector.multi_reduction <add>, %17, %cst_10 [1] : vector<4x2x128xf32> to vector<4x128xf32>
    %26 = arith.extui %21 : vector<4x2x128xi1> to vector<4x2x128xi32>
    %27 = arith.sitofp %26 : vector<4x2x128xi32> to vector<4x2x128xf32>
    %cst_11 = arith.constant dense<0.000000e+00> : vector<4x128xf32>
    %28 = vector.multi_reduction <add>, %27, %cst_11 [1] : vector<4x2x128xf32> to vector<4x128xf32>
    %c0_12 = arith.constant 0 : index
    %c0_13 = arith.constant 0 : index
    %c0_14 = arith.constant 0 : index
    %c0_15 = arith.constant 0 : index
    %c0_16 = arith.constant 0 : index
    %29 = vector.load %arg5[%c0_12, %c0_13, %c0_14, %c0_15, %c0_16] : memref<1x1x3x4x128xf32, #tpu.memory_space<vmem>>, vector<1x1x1x4x128xf32>
    %30 = vector.shape_cast %29 : vector<1x1x1x4x128xf32> to vector<4x128xf32>
    %31 = arith.addf %30, %24 : vector<4x128xf32>
    %c0_17 = arith.constant 0 : index
    %c0_18 = arith.constant 0 : index
    %c0_19 = arith.constant 0 : index
    %c0_20 = arith.constant 0 : index
    %c0_21 = arith.constant 0 : index
    %32 = vector.load %arg5[%c0_17, %c0_18, %c0_19, %c0_20, %c0_21] : memref<1x1x3x4x128xf32, #tpu.memory_space<vmem>>, vector<1x1x1x4x128xf32>
    %33 = vector.shape_cast %32 : vector<1x1x1x4x128xf32> to vector<4x128xf32>
    %34 = vector.shape_cast %31 : vector<4x128xf32> to vector<1x1x1x4x128xf32>
    tpu.vector_store %arg5[%c0_17, %c0_18, %c0_19, %c0_20, %c0_21], %34 {strides = array<i32>} : memref<1x1x3x4x128xf32, #tpu.memory_space<vmem>>, vector<1x1x1x4x128xf32>,
    %c0_22 = arith.constant 0 : index
    %c0_23 = arith.constant 0 : index
    %c1 = arith.constant 1 : index
    %c0_24 = arith.constant 0 : index
    %c0_25 = arith.constant 0 : index
    %35 = vector.load %arg5[%c0_22, %c0_23, %c1, %c0_24, %c0_25] : memref<1x1x3x4x128xf32, #tpu.memory_space<vmem>>, vector<1x1x1x4x128xf32>
    %36 = vector.shape_cast %35 : vector<1x1x1x4x128xf32> to vector<4x128xf32>
    %37 = arith.addf %36, %25 : vector<4x128xf32>
    %c0_26 = arith.constant 0 : index
    %c0_27 = arith.constant 0 : index
    %c1_28 = arith.constant 1 : index
    %c0_29 = arith.constant 0 : index
    %c0_30 = arith.constant 0 : index
    %38 = vector.load %arg5[%c0_26, %c0_27, %c1_28, %c0_29, %c0_30] : memref<1x1x3x4x128xf32, #tpu.memory_space<vmem>>, vector<1x1x1x4x128xf32>
    %39 = vector.shape_cast %38 : vector<1x1x1x4x128xf32> to vector<4x128xf32>
    %40 = vector.shape_cast %37 : vector<4x128xf32> to vector<1x1x1x4x128xf32>
    tpu.vector_store %arg5[%c0_26, %c0_27, %c1_28, %c0_29, %c0_30], %40 {strides = array<i32>} : memref<1x1x3x4x128xf32, #tpu.memory_space<vmem>>, vector<1x1x1x4x128xf32>,
    %c0_31 = arith.constant 0 : index
    %c0_32 = arith.constant 0 : index
    %c2 = arith.constant 2 : index
    %c0_33 = arith.constant 0 : index
    %c0_34 = arith.constant 0 : index
    %41 = vector.load %arg5[%c0_31, %c0_32, %c2, %c0_33, %c0_34] : memref<1x1x3x4x128xf32, #tpu.memory_space<vmem>>, vector<1x1x1x4x128xf32>
    %42 = vector.shape_cast %41 : vector<1x1x1x4x128xf32> to vector<4x128xf32>
    %43 = arith.addf %42, %28 : vector<4x128xf32>
    %c0_35 = arith.constant 0 : index
    %c0_36 = arith.constant 0 : index
    %c2_37 = arith.constant 2 : index
    %c0_38 = arith.constant 0 : index
    %c0_39 = arith.constant 0 : index
    %44 = vector.load %arg5[%c0_35, %c0_36, %c2_37, %c0_38, %c0_39] : memref<1x1x3x4x128xf32, #tpu.memory_space<vmem>>, vector<1x1x1x4x128xf32>
    %45 = vector.shape_cast %44 : vector<1x1x1x4x128xf32> to vector<4x128xf32>
    %46 = vector.shape_cast %43 : vector<4x128xf32> to vector<1x1x1x4x128xf32>
    tpu.vector_store %arg5[%c0_35, %c0_36, %c2_37, %c0_38, %c0_39], %46 {strides = array<i32>} : memref<1x1x3x4x128xf32, #tpu.memory_space<vmem>>, vector<1x1x1x4x128xf32>,
    return
  }
  func.func @transform_0(%arg0: i32, %arg1: i32, %arg2: i32) -> (i32, i32, i32, i32) {
    %c1_i32 = arith.constant 1 : i32
    %0 = arith.muli %arg1, %c1_i32 : i32
    %1 = arith.addi %0, %arg2 : i32
    %c0_i32 = arith.constant 0 : i32
    %2 = arith.minsi %1, %c0_i32 : i32
    %c0_i32_0 = arith.constant 0 : i32
    %c0_i32_1 = arith.constant 0 : i32
    %c0_i32_2 = arith.constant 0 : i32
    return %arg0, %c0_i32_0, %2, %c0_i32_1 : i32, i32, i32, i32
  }
  func.func @transform_1(%arg0: i32, %arg1: i32, %arg2: i32) -> (i32, i32, i32) {
    %c1_i32 = arith.constant 1 : i32
    %0 = arith.muli %arg1, %c1_i32 : i32
    %1 = arith.addi %0, %arg2 : i32
    %c0_i32 = arith.constant 0 : i32
    %c0_i32_0 = arith.constant 0 : i32
    return %arg0, %1, %c0_i32 : i32, i32, i32
  }
  func.func @transform_2(%arg0: i32, %arg1: i32, %arg2: i32) -> (i32, i32, i32, i32, i32) {
    %c0_i32 = arith.constant 0 : i32
    %c0_i32_0 = arith.constant 0 : i32
    %c0_i32_1 = arith.constant 0 : i32
    %c0_i32_2 = arith.constant 0 : i32
    return %arg0, %arg1, %c0_i32, %c0_i32_0, %c0_i32_1 : i32, i32, i32, i32, i32
  }
}

</mosaic_0001>

<bundles_post_ra>
// kernel: tpu_custom_call.1
= control target key start
LH: loop header
LB: loop body
LE: loop exit
PB: predicated region body
PF: predicated region fallthrough
CT: control target
= control target key end

     0   :  { %7 = vsyncpa [#allocation3], 0  ;;  %s1010_s0 = inlined_call_operand.hbm [shape: f32[2,4,2,128], index: 0, kind: input, shape index: {}]   ;;  %s1011_s1 = inlined_call_operand.vmem [shape: s8[2,2,128], index: 1, kind: input, shape index: {}]   ;;  %s1012_s2 = inlined_call_operand.hbm [shape: f32[2,1,3,4,128], index: 2, kind: output, shape index: {}]  }
   0x1   :  { %9 = vsyncpa [#allocation3 + $0x1], 0 }
   0x2   :  { %10 = vsyncpa [#allocation4], 0 }
   0x3   :  { %12 = vsyncpa [#allocation4 + $0x1], 0  ;;  %s766_s9 = smov 0   ;;  %s768_s10 = smov 0  }
   0x4   :  { %s770_s11 = smov 0   ;;  %s772_s12 = smov 0  }
   0x5   :  { %s774_s13 = smov 0   ;;  %s776_s14 = smov 0  }
   0x6 LB: > { %s530_s15 = sadd.s32 4294967295, %s742_s14   ;;  %s531_s16 = sadd.s32 4294967294, %s742_s14   ;;  %s742_s14 = sphi %s776_s14, %s18_s14   ;;  %s738_s13 = sphi %s774_s13, %s1027_s13   ;;  %s734_s12 = sphi %s772_s12, %s1026_s12   ;;  %s730_s11 = sphi %s770_s11, %s1025_s11   ;;  %s726_s10 = sphi %s768_s10, %s1024_s10   ;;  %s722_s9 = sphi %s766_s9, %s1023_s9  }
   0x7   : > { %s37_s17 = sadd.s32 1, %s738_s13  ;;  %s52_s18 = sadd.s32 1, %s730_s11 }
   0x8   : > { %p39_p0 = scmp.ge.s32.totalorder %s37_s17, 2  ;;  %p59_p1 = scmp.ne.s32.totalorder %s730_s11, %s726_s10 }
   0x9   : > { %p60_p2 = scmp.eq.s32.totalorder %s742_s14, 0  ;;  %p65_p3 = scmp.ne.s32.totalorder %s726_s10, %s722_s9 }
   0xa   : > { %s1029_s17 = smov (%p39_p0, %s37_s17), 0  ;;  %p66_p5 = scmp.eq.s32.totalorder %s530_s15, 0 }
   0xb   : > { %p807_p4 = por %p60_p2, %p59_p1  ;;  %s47_s20 = ssub.s32 %s738_s13, %s1029_s17 }
   0xc   : > { %p121_p6 = scmp.eq.s32.totalorder %s530_s15, 1  ;;  %p50_p7 = scmp.eq.s32.totalorder %s47_s20, 0 }
   0xd   : > { %p813_p8 = por %p66_p5, %p65_p3  ;;  %p127_p10 = scmp.eq.s32.totalorder %s531_s16, 1 }
   0xe   : > { %p817_p9 = por %p121_p6, %p59_p1  ;;  %p565_p13 = scmp.lt.s32.totalorder %s742_s14, 2 }
   0xf   : > { %s822_s23 = scalar_select %p50_p7, %s730_s11, %s52_s18  }
  0x10   : > { %s1016_s22 = scalar_select %p817_p9, 1, 0 }
  0x11   : > { %p824_p11 = por %p127_p10, %p65_p3  ;;  %s147_s25 = sand.u32 1, %s730_s11  }
  0x12   : > { %s534_s26 = sshll.u32 %s147_s25, 3  ;;  %s550_s27 = sshll.u32 %s738_s13, 7 }
  0x13   : > { %s1017_s24 = scalar_select %p824_p11, 1, 0 }
  0x14   : > { %s835_s30 = scalar_lea.hbm %s1010_s0, %s550_s27  ;;  %s151_s3 = scalar_lea.vmem [#allocation2], %s534_s26 }
  0x15   : > { %s162_s4 = sshll.u32 %s151_s3, 4  ;;  %p841_p0 = pnand %p565_p13, %p807_p4  ;;  %s837_s4 = int_to_ptr.vmem [resolvable:$true] %s162_s4 }
  0x16   : > { %s846_s6 = scalar_lea.sflag [#allocation3], %s147_s25  ;;  %s630_s7 = scalar_lea.hbm %s835_s30, 128 }
  0x17   : > { %p631_p2 = scmp.ne.s32.totalorder %s835_s30, %s630_s7  ;;  %p632_p3 = pneg %p841_p0 }
  0x18   : > { %s635_s16 = scalar_lea.hbm %s1010_s0, 256  ;;  %p636_p4 = scmp.lt.u32.totalorder %s835_s30, %s1010_s0 }
  0x19   : > { %p633_p5 = pnand %p632_p3, %p631_p2  ;;  %p637_p7 = scmp.lt.u32.totalorder %s635_s16, %s630_s7 }
  0x1a   : > { %p639_p13 = scmp.lt.u32.totalorder %s630_s7, %s835_s30 }
  0x1b   : > { %p634_p6 = pneg %p633_p5  ;;  %p638_p10 = por %p637_p7, %p636_p4 }
  0x1d   : > { %p640_p12 = por %p639_p13, %p638_p10 }
  0x1f   : > { %p641_p1 = pnand %p640_p12, %p634_p6 }
  0x21   : > { %644 = shalt.err (!%p641_p1)
}
  0x22   : > { %s645_s20 = scalar_lea.vmem %s837_s4, 128  ;;  %s744_s25 = smov [#allocation2]  }
  0x23   : > { %p646_p2 = scmp.ne.s32.totalorder %s837_s4, %s645_s20  ;;  %s650_s26 = sshll.u32 %s744_s25, 4  ;;  %s651_s26 = int_to_ptr.vmem [resolvable:$false] %s650_s26 }
  0x24   : > { %s652_s27 = scalar_lea.vmem %s651_s26, 256  ;;  %p653_p9 = scmp.lt.s32.totalorder %s837_s4, %s651_s26 }
  0x25   : > { %p648_p5 = pnand %p646_p2, %p632_p3  ;;  %p654_p4 = scmp.lt.s32.totalorder %s652_s27, %s645_s20 }
  0x27   : > { %p649_p11 = pneg %p648_p5  ;;  %p655_p7 = por %p654_p4, %p653_p9 }
  0x29   : > { %p656_p10 = pnand %p655_p7, %p649_p11 }
  0x2b   : > { %659 = shalt.err (!%p656_p10)
}
  0x2c   : > { %s745_s28 = smov 32   ;;  %s746_s29 = smov 2  }
  0x2d   : > { %560 = dma.hbm_to_vmem [thread:$0]  (!%p841_p0), %s835_s30, 128, %s837_s4, %s846_s6, %s745_s28, %s745_s28, %s746_s29  }
  0x2e   : > { %p181_p12 = scmp.lt.s32.totalorder %s742_s14, 3  ;;  %p1019_p1 = scmp.ge.s32.totalorder %s742_s14, 1 }
  0x30   : > { %p182_p3 = pnand %p1019_p1, %p181_p12 }
  0x31   : > { %s878_s3 = sand.u32 (!%p182_p3), 1, %s726_s10  }
  0x32   : > { %185 = sbr.rel (%p182_p3) target bundleno = 141 (0x8d), region = 28  ;;  %s538_s7 = sshll.u32 (!%p182_p3), %s878_s3, 3 }
  0x33   : > { %s188_s8 = scalar_lea.sflag (!%p182_p3), [#allocation3], %s878_s3  ;;  %s191_s15 = scalar_lea.vmem (!%p182_p3), [#allocation2], %s538_s7 }
  0x39   : > { %713 = dma.done.wait (%p813_p8), %s188_s8, 128  }
  0x3a   : > { %715 = vsyncadd (%p813_p8), %s188_s8, 4294967168  ;;  %s551_s30 = smul.u32 12, %s878_s3  ;;  %p223_p9 = scmp.lt.s32.totalorder %s734_s12, 1  ;;  %v747_v0 = vmov 0.0   ;;  %vm243_vm0 = vcmask 1041408   ;;  %vm380_vm5 = vcmask 1041409  }
  0x3b   : > { %v237_v1 = vld [vmem:[%s191_s15] sm:$0x3]  ;;  %v238_v2 = vld [vmem:[%s191_s15 + $0x2] sm:$0x3]  ;;  %v239_v3 = vld [vmem:[%s191_s15 + $0x4] sm:$0x3] }
  0x3c   : > { %s888_s4 = scalar_lea.vmem [#allocation5], %s551_s30  ;;  %v240_v4 = vld [vmem:[%s191_s15 + $0x6] sm:$0x3]  ;;  %v244_v6 = vsel %vm243_vm0, %v237_v1, -inf  ;;  %v245_v7 = vsel %vm243_vm0, %v238_v2, -inf  ;;  %v246_v9 = vsel %vm243_vm0, %v239_v3, -inf }
  0x3d   : > { %234 = vst [vmem:[%s888_s4] sm:$0xf] %v747_v0  ;;  %235 = vst [vmem:[%s888_s4 + $0x4] sm:$0xf] %v747_v0  ;;  %s224_s5 = scalar_select %p223_p9, %s734_s12, 1  ;;  %v247_v10 = vsel %vm243_vm0, %v240_v4, -inf  ;;  %v248_v11 = vmax.f32 %v244_v6, %v245_v7  ;;  %vm382_vm6 = vcmask 1042434  }
  0x3e   : > { %236 = vst [vmem:[%s888_s4 + $0x8] sm:$0xf] %v747_v0  ;;  %v249_v12 = vmax.f32 %v246_v9, %v247_v10  ;;  %vm384_vm7 = vcmask 1043459   ;;  %s552_s18 = smul.u32 192, %s734_s12  ;;  %s429_s19 = sshll.u32 %s888_s4, 4  ;;  %s960_s19 = int_to_ptr.vmem [resolvable:$true] %s429_s19 }
  0x3f   : > { %s228_s21 = scalar_lea.vmem %s1011_s1, %s224_s5  ;;  %s414_s12 = scalar_lea.sflag [#allocation4], %s878_s3 }
  0x40   : > { %v241_v5 = vld [vmem:[%s228_s21] sm:$0x1]  ;;  %v250_v13 = vmax.f32 %v248_v11, %v249_v12  ;;  %s958_s26 = scalar_lea.hbm %s1012_s2, %s552_s18  ;;  %s660_s27 = scalar_lea.vmem %s960_s19, 192 }
  0x41   : > { %v899_v8 = vunpack.c.0.s8 %v241_v5  ;;  %p661_p8 = scmp.ne.s32.totalorder %s960_s19, %s660_s27  ;;  %p1020_p11 = scmp.ne.s32.totalorder %s1016_s22, 0 }
  0x42   : > { %v251_v21 = vsub.f32 %v237_v1, %v250_v13  ;;  %v252_v22 = vsub.f32 %v238_v2, %v250_v13  ;;  %v253_v23 = vsub.f32 %v239_v3, %v250_v13  ;;  %v254_v24 = vsub.f32 %v240_v4, %v250_v13  ;;  %s748_s28 = smov [#allocation5]  }
  0x43   : > { %vm275_vm1 = vcmp.eq.s32.totalorder %v899_v8, 0  ;;  %vm276_vm2 = vcmp.eq.s32.totalorder %v899_v8, 1  ;;  %vm277_vm3 = vcmp.eq.s32.totalorder %v899_v8, 2  ;;  %vm278_vm4 = vcmp.eq.s32.totalorder %v899_v8, 3  ;;  %p662_p0 = pnand %p661_p8, %p1020_p11  ;;  %s664_s29 = sshll.u32 %s748_s28, 4  ;;  %s665_s29 = int_to_ptr.vmem [resolvable:$false] %s664_s29 }
  0x44   : > { %v539_v14 = vsel %vm275_vm1, 1.0, %v747_v0  ;;  %v540_v15 = vsel %vm276_vm2, 1.0, %v747_v0  ;;  %v541_v16 = vsel %vm277_vm3, 1.0, %v747_v0  ;;  %v542_v17 = vsel %vm278_vm4, 1.0, %v747_v0  ;;  %s666_s7 = scalar_lea.vmem %s665_s29, 384  ;;  %p667_p13 = scmp.lt.s32.totalorder %s960_s19, %s665_s29 }
  0x45   : > { %v347_v18 = vsel %vm243_vm0, %v539_v14, 0.0  ;;  %v354_v19 = vsel %vm243_vm0, %v540_v15, 0.0  ;;  %v361_v20 = vsel %vm243_vm0, %v541_v16, 0.0  ;;  %v368_v28 = vsel %vm243_vm0, %v542_v17, 0.0  ;;  %v545_v56 = vld [vmem:[%s888_s4 + $0x8] sm:$0xf]  ;;  %p663_p6 = pneg %p662_p0  ;;  %p668_p2 = scmp.lt.s32.totalorder %s666_s7, %s660_s27 }
  0x46   : > { %v348_v25 = vrot.slane %v347_v18, 4  ;;  %v355_v26 = vrot.slane %v354_v19, 4  ;;  %v362_v27 = vrot.slane %v361_v20, 4  ;;  %v255_v29 = vmul.f32 1.442695, %v251_v21 }
  0x47   : > { %v257_v30 = vmul.f32 1.442695, %v252_v22  ;;  %v259_v31 = vmul.f32 1.442695, %v253_v23  ;;  %v261_v32 = vmul.f32 1.442695, %v254_v24  ;;  %p669_p5 = por %p668_p2, %p667_p13 }
  0x48   : > { %v349_v33 = vadd.f32 %v348_v25, %v347_v18  ;;  %v356_v34 = vadd.f32 %v355_v26, %v354_v19  ;;  %v363_v35 = vadd.f32 %v362_v27, %v361_v20  ;;  %620 = vpow2.f32 %v255_v29 }
  0x49   : > { %v369_v36 = vrot.slane %v368_v28, 4  ;;  %622 = vpow2.f32 %v257_v30  ;;  %p670_p4 = pnand %p669_p5, %p663_p6 }
  0x4a   : > { %v350_v37 = vrot.slane %v349_v33, 2  ;;  %v357_v38 = vrot.slane %v356_v34, 2  ;;  %v364_v39 = vrot.slane %v363_v35, 2  ;;  %624 = vpow2.f32 %v259_v31 }
  0x4b   : > { %v370_v40 = vadd.f32 %v369_v36, %v368_v28  ;;  %626 = vpow2.f32 %v261_v32 }
  0x4c   : > { %v351_v41 = vadd.f32 %v350_v37, %v349_v33  ;;  %v358_v42 = vadd.f32 %v357_v38, %v356_v34  ;;  %v365_v43 = vadd.f32 %v364_v39, %v363_v35 }
  0x4d   : > { %v371_v44 = vrot.slane %v370_v40, 2 }
  0x4e   : > { %v352_v45 = vrot.slane %v351_v41, 1  ;;  %v359_v46 = vrot.slane %v358_v42, 1  ;;  %v366_v47 = vrot.slane %v365_v43, 1 }
  0x4f   : > { %v372_v48 = vadd.f32 %v371_v44, %v370_v40 }
  0x50   : > { %v353_v49 = vadd.f32 %v352_v45, %v351_v41  ;;  %v360_v50 = vadd.f32 %v359_v46, %v358_v42  ;;  %v367_v51 = vadd.f32 %v366_v47, %v365_v43 }
  0x51   : > { %v373_v52 = vrot.slane %v372_v48, 1 }
  0x52   : > { %v407_v53 = vsel %vm380_vm5, %v360_v50, %v353_v49  ;;  %v621_v54 = vpop.eup %620 }
  0x53   : > { %v374_v55 = vadd.f32 %v373_v52, %v372_v48  ;;  %v408_v57 = vsel %vm382_vm6, %v367_v51, %v407_v53  ;;  %v623_v58 = vpop.eup %622  ;;  %v263_v59 = vsel %vm243_vm0, %v621_v54, 0.0 }
  0x54   : > { %v625_v60 = vpop.eup %624  ;;  %v264_v61 = vsel %vm243_vm0, %v623_v58, 0.0 }
  0x55   : > { %v409_v62 = vsel %vm384_vm7, %v374_v55, %v408_v57  ;;  %v627_v63 = vpop.eup %626  ;;  %v265_v0 = vadd.f32 %v264_v61, %v263_v59  ;;  %v266_v1 = vsel %vm243_vm0, %v625_v60, 0.0 }
  0x56   : > { %v411_v2 = vadd.f32 %v545_v56, %v409_v62  ;;  %v268_v3 = vsel %vm243_vm0, %v627_v63, 0.0 }
  0x57   : > { %v267_v4 = vadd.f32 %v266_v1, %v265_v0 }
  0x58   : > { %546 = vst [vmem:[%s888_s4 + $0x8] sm:$0xf] %v411_v2 }
  0x59   : > { %v269_v5 = vadd.f32 %v268_v3, %v267_v4  ;;  %v375_v3 = vld [vmem:[%s888_s4] sm:$0xf] }
  0x5b   : > { %628 = vrcp.f32 %v269_v5 }
  0x65   : > { %v629_v6 = vpop.eup %628 }
  0x66   : > { %v271_v7 = vmul.f32 %v629_v6, %v621_v54  ;;  %v272_v9 = vmul.f32 %v629_v6, %v623_v58  ;;  %v273_v10 = vmul.f32 %v629_v6, %v625_v60  ;;  %v274_v11 = vmul.f32 %v629_v6, %v627_v63 }
  0x68   : > { %v279_v12 = vsel %vm275_vm1, %v271_v7, 0.0  ;;  %v280_v13 = vsel %vm276_vm2, %v272_v9, 0.0  ;;  %v281_v14 = vsel %vm277_vm3, %v273_v10, 0.0  ;;  %v282_v15 = vsel %vm278_vm4, %v274_v11, 0.0 }
  0x69   : > { %v283_v16 = vsel %vm243_vm0, %v279_v12, 0.0  ;;  %v290_v17 = vsel %vm243_vm0, %v280_v13, 0.0  ;;  %v297_v18 = vsel %vm243_vm0, %v281_v14, 0.0  ;;  %v304_v19 = vsel %vm243_vm0, %v282_v15, 0.0  ;;  %v543_v13 = vld [vmem:[%s888_s4 + $0x4] sm:$0xf] }
  0x6a   : > { %v284_v20 = vrot.slane %v283_v16, 4  ;;  %v291_v21 = vrot.slane %v290_v17, 4  ;;  %v298_v22 = vrot.slane %v297_v18, 4  ;;  %v305_v23 = vrot.slane %v304_v19, 4 }
  0x6b   : > { %v311_v24 = vsel %vm243_vm0, %v271_v7, 0.0  ;;  %v318_v25 = vsel %vm243_vm0, %v272_v9, 0.0  ;;  %v325_v26 = vsel %vm243_vm0, %v273_v10, 0.0  ;;  %v332_v8 = vsel %vm243_vm0, %v274_v11, 0.0 }
  0x6c   : > { %v285_v27 = vadd.f32 %v284_v20, %v283_v16  ;;  %v292_v28 = vadd.f32 %v291_v21, %v290_v17  ;;  %v299_v29 = vadd.f32 %v298_v22, %v297_v18  ;;  %v306_v30 = vadd.f32 %v305_v23, %v304_v19 }
  0x6d   : > { %v312_v31 = vrot.slane %v311_v24, 4  ;;  %v319_v32 = vrot.slane %v318_v25, 4  ;;  %v326_v33 = vrot.slane %v325_v26, 4  ;;  %v333_v34 = vrot.slane %v332_v8, 4 }
  0x6e   : > { %v286_v35 = vrot.slane %v285_v27, 2  ;;  %v293_v36 = vrot.slane %v292_v28, 2  ;;  %v300_v37 = vrot.slane %v299_v29, 2  ;;  %v307_v38 = vrot.slane %v306_v30, 2 }
  0x6f   : > { %v313_v39 = vadd.f32 %v312_v31, %v311_v24  ;;  %v320_v40 = vadd.f32 %v319_v32, %v318_v25  ;;  %v327_v41 = vadd.f32 %v326_v33, %v325_v26  ;;  %v334_v42 = vadd.f32 %v333_v34, %v332_v8 }
  0x70   : > { %v287_v43 = vadd.f32 %v286_v35, %v285_v27  ;;  %v294_v44 = vadd.f32 %v293_v36, %v292_v28  ;;  %v301_v45 = vadd.f32 %v300_v37, %v299_v29  ;;  %v308_v46 = vadd.f32 %v307_v38, %v306_v30 }
  0x71   : > { %v314_v47 = vrot.slane %v313_v39, 2  ;;  %v321_v48 = vrot.slane %v320_v40, 2  ;;  %v328_v49 = vrot.slane %v327_v41, 2  ;;  %v335_v50 = vrot.slane %v334_v42, 2 }
  0x72   : > { %v288_v51 = vrot.slane %v287_v43, 1  ;;  %v295_v52 = vrot.slane %v294_v44, 1  ;;  %v302_v53 = vrot.slane %v301_v45, 1  ;;  %v309_v54 = vrot.slane %v308_v46, 1 }
  0x73   : > { %v315_v55 = vadd.f32 %v314_v47, %v313_v39  ;;  %v322_v56 = vadd.f32 %v321_v48, %v320_v40  ;;  %v329_v57 = vadd.f32 %v328_v49, %v327_v41  ;;  %v336_v58 = vadd.f32 %v335_v50, %v334_v42 }
  0x74   : > { %v289_v59 = vadd.f32 %v288_v51, %v287_v43  ;;  %v296_v60 = vadd.f32 %v295_v52, %v294_v44  ;;  %v303_v61 = vadd.f32 %v302_v53, %v301_v45  ;;  %v310_v62 = vadd.f32 %v309_v54, %v308_v46 }
  0x75   : > { %v316_v63 = vrot.slane %v315_v55, 1  ;;  %v323_v0 = vrot.slane %v322_v56, 1  ;;  %v330_v1 = vrot.slane %v329_v57, 1  ;;  %v337_v2 = vrot.slane %v336_v58, 1 }
  0x76   : > { %v381_v4 = vsel %vm380_vm5, %v296_v60, %v289_v59 }
  0x77   : > { %v383_v5 = vsel %vm382_vm6, %v303_v61, %v381_v4  ;;  %v317_v6 = vadd.f32 %v316_v63, %v315_v55  ;;  %v324_v7 = vadd.f32 %v323_v0, %v322_v56  ;;  %v331_v9 = vadd.f32 %v330_v1, %v329_v57 }
  0x78   : > { %v385_v10 = vsel %vm384_vm7, %v310_v62, %v383_v5  ;;  %v338_v11 = vadd.f32 %v337_v2, %v336_v58 }
  0x79   : > { %v387_v12 = vadd.f32 %v385_v10, %v375_v3  ;;  %v395_v14 = vsel %vm380_vm5, %v324_v7, %v317_v6 }
  0x7a   : > { %v396_v15 = vsel %vm382_vm6, %v331_v9, %v395_v14 }
  0x7b   : > { %388 = vst [vmem:[%s888_s4] sm:$0xf] %v387_v12  ;;  %v397_v16 = vsel %vm384_vm7, %v338_v11, %v396_v15 }
  0x7c   : > { %v399_v17 = vadd.f32 %v543_v13, %v397_v16 }
  0x7e   : > { %544 = vst [vmem:[%s888_s4 + $0x4] sm:$0xf] %v399_v17 }
  0x7f   : > { %673 = shalt.err (!%p670_p4)
}
  0x80   : > { %s674_s8 = scalar_lea.hbm %s958_s26, 192  ;;  %s678_s4 = scalar_lea.hbm %s1012_s2, 384 }
  0x81   : > { %p675_p7 = scmp.ne.s32.totalorder %s958_s26, %s674_s8  ;;  %p679_p1 = scmp.lt.u32.totalorder %s958_s26, %s1012_s2 }
  0x82   : > { %p680_p3 = scmp.lt.u32.totalorder %s678_s4, %s674_s8  ;;  %p682_p8 = scmp.lt.u32.totalorder %s674_s8, %s958_s26 }
  0x83   : > { %p676_p10 = pnand %p675_p7, %p1020_p11 }
  0x84   : > { %p681_p9 = por %p680_p3, %p679_p1 }
  0x85   : > { %p677_p12 = pneg %p676_p10 }
  0x86   : > { %p683_p0 = por %p682_p8, %p681_p9 }
  0x88   : > { %p684_p6 = pnand %p683_p0, %p677_p12 }
  0x8a   : > { %687 = shalt.err (!%p684_p6)
}
  0x8b   : > { %s749_s16 = smov 64   ;;  %s750_s21 = smov 4  }
  0x8c   : > { %555 = dma.vmem_to_hbm [thread:$0]  (%p1020_p11), %s960_s19, 192, %s958_s26, %s414_s12, %s749_s16, %s749_s16, %s750_s21  }
  0x8d PF: > { %s444_s18 = sand.u32 1, %s722_s9   ;;  %p1021_p13 = scmp.ne.s32.totalorder %s1017_s24, 0 }
  0x8e   : > { %p1022_p2 = scmp.ge.s32.totalorder %s742_s14, 2  ;;  %s445_s20 = scalar_lea.sflag [#allocation4], %s444_s18 }
  0x90   : > { %p562_p5 = pnand %p1022_p2, %p1021_p13 }
  0x92   : > { %717 = dma.done.wait (!%p562_p5), %s445_s20, 192  }
  0x93   : > { %719 = vsyncadd (!%p562_p5), %s445_s20, 4294967104  ;;  %s18_s14 = sadd.s32 1, %s742_s14   ;;  %s1023_s9 = smov %s726_s10 }
  0x94   : > { %p15_p4 = scmp.ge.s32.totalorder %s18_s14, 4   ;;  %s1024_s10 = smov %s730_s11 }
  0x95   : > { %s1025_s11 = smov %s822_s23  ;;  %s1026_s12 = smov %s738_s13 }
  0x96   : > { %s1027_s13 = smov %s1029_s17  ;;  %17 = sbr.rel (!%p15_p4) target bundleno = 6 (0x6), region = 82 }
  0x9d   :  { %450 = vsyncpa [#allocation3], 1 }
  0x9e   :  { %452 = vsyncpa [#allocation3 + $0x1], 1 }
  0x9f   :  { %453 = vsyncpa [#allocation4], 1 }
  0xa0   :  { %455 = vsyncpa [#allocation4 + $0x1], 1 }

</bundles_post_ra>
